<compile_context>
chip_gen: v5e
topology: v5e:2x2
jax: 0.10.0
libtpu: 0.0.40
codegen_flags: <defaults>
</compile_context>

<pallas_src>
import math

import jax
import jax.numpy as jnp
from jax.experimental import pallas as pl
from jax.experimental.pallas import tpu as pltpu

BN_EPS = 1e-5


def _shopee_head_kernel(x_ref, w_ref, b_ref, out_ref, acc_ref):
    # x_ref:   (TB, TC, HW)  backbone feature-map tile (spatial on the lane axis)
    # w_ref:   (C,  fc_dim)  folded weight  W^T * bn_scale / (H*W)  -- VMEM-resident
    # b_ref:   (1,  fc_dim)  folded bias    (b - mean) * bn_scale + beta
    # out_ref: (TB, fc_dim)
    # acc_ref: (TB, fc_dim)  float32 accumulator (VMEM scratch)
    j = pl.program_id(1)

    @pl.when(j == 0)
    def _():
        acc_ref[...] = jnp.zeros_like(acc_ref)

    # AdaptiveAvgPool2d(1): sum over spatial; the 1/(H*W) scale is folded into w_ref.
    # Dropout(p=0.0) is identity.
    pooled = jnp.sum(x_ref[...].astype(jnp.float32), axis=-1)        # (TB, TC)

    tc = x_ref.shape[1]
    c0 = pl.multiple_of(j * tc, tc)
    w_chunk = w_ref[pl.ds(c0, tc), :]                                # (TC, fc_dim)
    acc_ref[...] += jnp.dot(pooled, w_chunk,
                            preferred_element_type=jnp.float32)

    @pl.when(j == pl.num_programs(1) - 1)
    def _():
        out_ref[...] = (acc_ref[...] + b_ref[...]).astype(out_ref.dtype)


def _pick_batch_tile(B):
    if B <= 64:
        return B
    for t in (64, 32, 16, 8):
        if B % t == 0:
            return t
    return 1


def _pick_channel_tile(C, TB, HW, itemsize, budget_bytes):
    # Largest C-chunk (multiple of 16, for bf16 sublane packing) whose
    # double-buffered x tile fits the per-input VMEM budget.
    if 2 * TB * C * HW * itemsize <= budget_bytes:
        return C
    for tc in (2048, 1024, 512, 256, 128, 64, 32, 16):
        if C % tc == 0 and 2 * TB * tc * HW * itemsize <= budget_bytes:
            return tc
    return C  # fall back to the full extent (exempt from the (8,128) rule)


def shopee_extract_feat(feat_nchw, fc_weight, fc_bias,
                        bn_gamma, bn_beta, bn_mean, bn_var,
                        x_tile_budget_bytes=8 * 1024 * 1024):
    """ShopeeModel.extract_feat head (eval mode).

    feat_nchw: [B, C, H, W] backbone output (bf16 recommended in HBM).
    Returns [B, fc_dim] float32 features.
    """
    B, C, H, W = feat_nchw.shape
    HW = H * W
    fc_dim = fc_weight.shape[0]

    # Fold eval-mode BatchNorm1d + pooling scale into the FC weight/bias.
    scale = bn_gamma.astype(jnp.float32) * jax.lax.rsqrt(
        bn_var.astype(jnp.float32) + BN_EPS)                          # [fc_dim]
    w_folded = (fc_weight.astype(jnp.float32).T * scale[None, :]) / float(HW)
    b_folded = ((fc_bias.astype(jnp.float32) - bn_mean.astype(jnp.float32)) * scale
                + bn_beta.astype(jnp.float32)).reshape(1, fc_dim)

    x_flat = feat_nchw.reshape(B, C, HW)

    TB = _pick_batch_tile(B)
    TC = _pick_channel_tile(C, TB, HW, x_flat.dtype.itemsize, x_tile_budget_bytes)
    grid = (B // TB, C // TC)

    return pl.pallas_call(
        _shopee_head_kernel,
        out_shape=jax.ShapeDtypeStruct((B, fc_dim), jnp.float32),
        grid=grid,
        in_specs=[
            pl.BlockSpec((TB, TC, HW), lambda i, j: (i, j, 0)),       # streamed
            pl.BlockSpec((C, fc_dim), lambda i, j: (0, 0)),           # resident, DMA once
            pl.BlockSpec((1, fc_dim), lambda i, j: (0, 0)),           # resident
        ],
        out_specs=pl.BlockSpec((TB, fc_dim), lambda i, j: (i, 0)),
        scratch_shapes=[pltpu.VMEM((TB, fc_dim), jnp.float32)],
        compiler_params=pltpu.CompilerParams(
            dimension_semantics=("parallel", "arbitrary"),
            vmem_limit_bytes=48 * 1024 * 1024,
        ),
    )(x_flat, w_folded, b_folded)


def _xavier_normal(key, out_f, in_f):
    std = math.sqrt(2.0 / (in_f + out_f))
    return std * jax.random.normal(key, (out_f, in_f), dtype=jnp.float32)


def _reference(feat, w, b, g, bt, m, v):
    pooled = jnp.mean(feat.astype(jnp.float32), axis=(2, 3))
    y = pooled @ w.T + b
    return (y - m) / jnp.sqrt(v + BN_EPS) * g + bt


if __name__ == "__main__":
    # Small shapes consistent with the module: backbone feature map [B, C, H, W]
    # -> fc_dim features (fc_dim kept a multiple of 128 for lane-dense output).
    B, C, H, W = 2, 64, 8, 8
    FC_DIM = 128

    key = jax.random.PRNGKey(0)
    k_feat, k_w = jax.random.split(key)

    # "Backbone output" stand-in, kept bf16 in HBM (backbone itself not translated).
    feat = jax.random.normal(k_feat, (B, C, H, W), dtype=jnp.float32)
    feat = feat.astype(jnp.bfloat16)

    # Deterministic parameter init mirroring _init_params():
    fc_weight = _xavier_normal(k_w, FC_DIM, C)            # xavier_normal_
    fc_bias = jnp.zeros((FC_DIM,), jnp.float32)           # constant_ 0
    bn_gamma = jnp.ones((FC_DIM,), jnp.float32)           # constant_ 1
    bn_beta = jnp.zeros((FC_DIM,), jnp.float32)           # constant_ 0
    bn_mean = jnp.zeros((FC_DIM,), jnp.float32)           # fresh running_mean
    bn_var = jnp.ones((FC_DIM,), jnp.float32)             # fresh running_var

    # Small tile budget so the demo actually exercises the C-reduction grid
    # (2 channel chunks) and the accumulator path.
    out = shopee_extract_feat(feat, fc_weight, fc_bias,
                              bn_gamma, bn_beta, bn_mean, bn_var,
                              x_tile_budget_bytes=16 * 1024)
    out = jax.block_until_ready(out)

    ref = _reference(feat, fc_weight, fc_bias, bn_gamma, bn_beta, bn_mean, bn_var)
    assert out.shape == (B, FC_DIM)
    assert jnp.allclose(out, ref, atol=1e-3, rtol=1e-3), "mismatch vs reference"
    print("KERNEL_OK")
</pallas_src>

<mosaic_0001>
module attributes {stable_mosaic.version = 11 : i64} {
  func.func @_shopee_head_kernel(%arg0: i32, %arg1: i32, %arg2: memref<2x32x64xbf16, #tpu.memory_space<vmem>>, %arg3: memref<64x128xf32, #tpu.memory_space<vmem>>, %arg4: memref<1x128xf32, #tpu.memory_space<vmem>>, %arg5: memref<2x128xf32, #tpu.memory_space<vmem>>, %arg6: memref<2x128xf32, #tpu.memory_space<vmem>>) attributes {dimension_semantics = [#tpu.dimension_semantics<parallel>, #tpu.dimension_semantics<arbitrary>], iteration_bounds = array<i64: 1, 2>, scalar_prefetch = 0 : i64, scratch_operands = 1 : i64, tpu.core_type = #tpu.core_type<tc>, window_params = [{transform_indices = @transform_0, window_bounds = array<i64: 2, 32, 64>}, {pipeline_mode = #tpu.pipeline_mode<synchronous>, transform_indices = @transform_1, window_bounds = array<i64: 64, 128>}, {pipeline_mode = #tpu.pipeline_mode<synchronous>, transform_indices = @transform_2, window_bounds = array<i64: 1, 128>}, {transform_indices = @transform_3, window_bounds = array<i64: 2, 128>}]} {
    %c0_i32 = arith.constant 0 : i32
    %0 = arith.cmpi eq, %arg1, %c0_i32 : i32
    %1 = arith.extui %0 : i1 to i32
    %c0_i32_0 = arith.constant 0 : i32
    %2 = arith.cmpi ne, %1, %c0_i32_0 : i32
    scf.if %2 {
      %cst_10 = arith.constant 0.000000e+00 : f32
      %17 = vector.broadcast %cst_10 : f32 to vector<2x128xf32>
      %c0_11 = arith.constant 0 : index
      %c0_12 = arith.constant 0 : index
      %18 = vector.load %arg6[%c0_11, %c0_12] : memref<2x128xf32, #tpu.memory_space<vmem>>, vector<2x128xf32>
      tpu.vector_store %arg6[%c0_11, %c0_12], %17 {strides = array<i32>} : memref<2x128xf32, #tpu.memory_space<vmem>>, vector<2x128xf32>,
    } else {
    }
    %c0 = arith.constant 0 : index
    %c0_1 = arith.constant 0 : index
    %c0_2 = arith.constant 0 : index
    %3 = vector.load %arg2[%c0, %c0_1, %c0_2] : memref<2x32x64xbf16, #tpu.memory_space<vmem>>, vector<2x32x64xbf16>
    %4 = arith.extf %3 : vector<2x32x64xbf16> to vector<2x32x64xf32>
    %cst = arith.constant dense<0.000000e+00> : vector<2x32xf32>
    %5 = vector.multi_reduction <add>, %4, %cst [2] : vector<2x32x64xf32> to vector<2x32xf32>
    %c32_i32 = arith.constant 32 : i32
    %6 = arith.muli %arg1, %c32_i32 : i32
    %7 = tpu.assume_multiple %6, 32 : i32
    %8 = arith.index_cast %7 : i32 to index
    %c0_3 = arith.constant 0 : index
    %9 = vector.load %arg3[%8, %c0_3] : memref<64x128xf32, #tpu.memory_space<vmem>>, vector<32x128xf32>
    %c0_4 = arith.constant 0 : index
    %c0_5 = arith.constant 0 : index
    %10 = vector.load %arg6[%c0_4, %c0_5] : memref<2x128xf32, #tpu.memory_space<vmem>>, vector<2x128xf32>
    %cst_6 = arith.constant dense<0.000000e+00> : vector<2x128xf32>
    %11 = tpu.matmul %5, %9, %cst_6 {dimension_numbers = #tpu.dot_dimension_numbers<[1], [0], [0], [1], [0, 0, 1, 1], [], []>} : vector<2x32xf32>, vector<32x128xf32>, vector<2x128xf32> -> vector<2x128xf32>
    %12 = arith.addf %10, %11 : vector<2x128xf32>
    %c0_7 = arith.constant 0 : index
    %c0_8 = arith.constant 0 : index
    %13 = vector.load %arg6[%c0_7, %c0_8] : memref<2x128xf32, #tpu.memory_space<vmem>>, vector<2x128xf32>
    tpu.vector_store %arg6[%c0_7, %c0_8], %12 {strides = array<i32>} : memref<2x128xf32, #tpu.memory_space<vmem>>, vector<2x128xf32>,
    %c1_i32 = arith.constant 1 : i32
    %14 = arith.cmpi eq, %arg1, %c1_i32 : i32
    %15 = arith.extui %14 : i1 to i32
    %c0_i32_9 = arith.constant 0 : i32
    %16 = arith.cmpi ne, %15, %c0_i32_9 : i32
    scf.if %16 {
      %c0_10 = arith.constant 0 : index
      %c0_11 = arith.constant 0 : index
      %17 = vector.load %arg6[%c0_10, %c0_11] : memref<2x128xf32, #tpu.memory_space<vmem>>, vector<2x128xf32>
      %c0_12 = arith.constant 0 : index
      %c0_13 = arith.constant 0 : index
      %18 = vector.load %arg4[%c0_12, %c0_13] : memref<1x128xf32, #tpu.memory_space<vmem>>, vector<1x128xf32>
      %19 = vector.broadcast %18 : vector<1x128xf32> to vector<2x128xf32>
      %20 = arith.addf %17, %19 : vector<2x128xf32>
      %c0_14 = arith.constant 0 : index
      %c0_15 = arith.constant 0 : index
      %21 = vector.load %arg5[%c0_14, %c0_15] : memref<2x128xf32, #tpu.memory_space<vmem>>, vector<2x128xf32>
      tpu.vector_store %arg5[%c0_14, %c0_15], %20 {strides = array<i32>} : memref<2x128xf32, #tpu.memory_space<vmem>>, vector<2x128xf32>,
    } else {
    }
    return
  }
  func.func @transform_0(%arg0: i32, %arg1: i32) -> (i32, i32, i32) {
    %c0_i32 = arith.constant 0 : i32
    %c0_i32_0 = arith.constant 0 : i32
    return %arg0, %arg1, %c0_i32 : i32, i32, i32
  }
  func.func @transform_1(%arg0: i32, %arg1: i32) -> (i32, i32) {
    %c0_i32 = arith.constant 0 : i32
    %c0_i32_0 = arith.constant 0 : i32
    %c0_i32_1 = arith.constant 0 : i32
    return %c0_i32, %c0_i32_0 : i32, i32
  }
  func.func @transform_2(%arg0: i32, %arg1: i32) -> (i32, i32) {
    %c0_i32 = arith.constant 0 : i32
    %c0_i32_0 = arith.constant 0 : i32
    %c0_i32_1 = arith.constant 0 : i32
    return %c0_i32, %c0_i32_0 : i32, i32
  }
  func.func @transform_3(%arg0: i32, %arg1: i32) -> (i32, i32) {
    %c0_i32 = arith.constant 0 : i32
    %c0_i32_0 = arith.constant 0 : i32
    return %arg0, %c0_i32 : i32, i32
  }
}

</mosaic_0001>

<bundles_post_ra>
// kernel: tpu_custom_call.1
= control target key start
LH: loop header
LB: loop body
LE: loop exit
PB: predicated region body
PF: predicated region fallthrough
CT: control target
= control target key end

     0   :  { %8 = vsyncpa [#allocation4], 0  ;;  %s866_s0 = inlined_call_operand.hbm [shape: bf16[2,64,64], index: 0, kind: input, shape index: {}]   ;;  %s867_s1 = inlined_call_operand.hbm [shape: f32[64,128], index: 1, kind: input, shape index: {}]   ;;  %s868_s2 = inlined_call_operand.vmem [shape: f32[1,128], index: 2, kind: input, shape index: {}]   ;;  %s869_s3 = inlined_call_operand.hbm [shape: f32[2,128], index: 3, kind: output, shape index: {}]  }
   0x1   :  { %10 = vsyncpa [#allocation4 + $0x1], 0 }
   0x2   :  { %11 = vsyncpa [#allocation7], 0 }
   0x3   :  { %12 = vsyncpa [#allocation5], 0  ;;  %s725_s12 = smov 0   ;;  %s727_s13 = smov 0  }
   0x4   :  { %s729_s14 = smov 0   ;;  %s731_s15 = smov 0  }
   0x5   :  { %s733_s16 = smov 0   ;;  %s735_s17 = smov 0  }
   0x6 LB: > { %s453_s18 = sadd.s32 4294967295, %s693_s17   ;;  %s27_s19 = sadd.s32 1, %s689_s16  ;;  %s693_s17 = sphi %s735_s17, %s18_s17   ;;  %s689_s16 = sphi %s733_s16, %s878_s16   ;;  %s685_s15 = sphi %s731_s15, %s877_s15   ;;  %s681_s14 = sphi %s729_s14, %s876_s14   ;;  %s677_s13 = sphi %s727_s13, %s875_s13   ;;  %s673_s12 = sphi %s725_s12, %s874_s12  }
   0x7   : > { %p28_p0 = scmp.ge.s32.totalorder %s27_s19, 2  ;;  %s39_s20 = sadd.s32 1, %s681_s14 }
   0x8   : > { %p46_p1 = scmp.ne.s32.totalorder %s681_s14, %s677_s13  ;;  %p47_p2 = scmp.eq.s32.totalorder %s693_s17, 0 }
   0x9   : > { %s880_s19 = smov (%p28_p0, %s27_s19), 0  ;;  %p52_p4 = scmp.ne.s32.totalorder %s677_s13, %s673_s12 }
   0xa   : > { %p761_p3 = por %p47_p2, %p46_p1  ;;  %s35_s22 = ssub.s32 %s689_s16, %s880_s19 }
   0xb   : > { %p770_p5 = scmp.eq.s32.totalorder %s453_s18, 0  ;;  %p37_p6 = scmp.eq.s32.totalorder %s35_s22, 0 }
   0xc   : > { %p454_p7 = scmp.ge.s32.totalorder %s693_s17, 1  ;;  %p131_p9 = scmp.lt.s32.totalorder %s693_s17, 3 }
   0xd   : > { %p777_p8 = por %p770_p5, %p52_p4  ;;  %s142_s29 = sshll.u32 %s867_s1, 4  ;;  %s143_s29 = int_to_ptr.hbm [resolvable:$true] %s142_s29 }
   0xe   : > { %s783_s25 = scalar_select %p37_p6, %s681_s14, %s39_s20  }
   0xf   : > { %p785_p10 = pnand %p454_p7, %p131_p9  ;;  %s695_s30 = smov [#allocation6]  }
  0x10   : > { %s144_s4 = sshll.u32 %s695_s30, 4  ;;  %s696_s5 = smov 128   ;;  %s145_s4 = int_to_ptr.vmem [resolvable:$true] %s144_s4 }
  0x11   : > { %p510_p11 = pneg %p785_p10  ;;  %s697_s6 = smov 8  }
  0x12   : > { %p456_p13 = scmp.ge.s32.totalorder %s693_s17, 2 }
  0x13   : > { %p511_p12 = pnand %p510_p11, %p770_p5 }
  0x14   : > { %157 = sbr.rel (%p456_p13) target bundleno = 38 (0x26), region = 24 }
  0x15   : > { %513 = dma.hbm_to_vmem [thread:$0]  (!%p511_p12), %s143_s29, 1024, %s145_s4, [#allocation7], %s696_s5, %s696_s5, %s697_s6  }
  0x19   : > { %s161_s7 = sand.u32 1, %s681_s14   ;;  %s473_s8 = sshll.u32 %s689_s16, 4 }
  0x1a   : > { %s457_s9 = sshll.u32 %s161_s7, 5  ;;  %s173_s12 = scalar_lea.hbm %s866_s0, %s473_s8 }
  0x1b   : > { %s495_s20 = scalar_select %p761_p3, [#allocation0], [#allocation11] }
  0x1c   : > { %s186_s22 = sshll.u32 %s173_s12, 4  ;;  %s165_s27 = scalar_lea.vmem [#allocation3], %s457_s9  ;;  %s187_s22 = int_to_ptr.hbm [resolvable:$true] %s186_s22 }
  0x1d   : > { %s188_s28 = sshll.u32 %s165_s27, 4  ;;  %s178_s29 = sld [smem:[%s495_s20]]   ;;  %s189_s28 = int_to_ptr.vmem [resolvable:$true] %s188_s28 }
  0x1e   : > { %s698_s30 = smov 512   ;;  %s699_s4 = smov 256  }
  0x1f   : > { %496 = sst [smem:[#allocation10]] (%p761_p3), %s698_s30  ;;  %s700_s5 = smov 4  }
  0x20   : > { %497 = sst [smem:[#allocation10 + $0x1]] (%p761_p3), %s699_s4  ;;  %s701_s6 = smov 64  }
  0x21   : > { %498 = sst [smem:[#allocation10 + $0x2]] (%p761_p3), %s700_s5  ;;  %s162_s10 = scalar_lea.sflag [#allocation4], %s161_s7 }
  0x22   : > { %499 = sst [smem:[#allocation10 + $0x3]] (%p761_p3), %s701_s6  ;;  %s702_s11 = smov [#allocation9]  }
  0x23   : > { %s460_s8 = sshll.u32 %s178_s29, 26  ;;  %500 = sst [smem:[#allocation10 + $0x4]] (%p761_p3), %s701_s6 }
  0x24   : > { %s461_s9 = sadd.s32 134217728, %s460_s8  ;;  %501 = sst [smem:[#allocation10 + $0x5]] (%p761_p3), %s700_s5 }
  0x25   : > { %502 = dma.general (%p761_p3), %s187_s22, 512, %s189_s28, %s162_s10, %s702_s11, [#allocation10], %s461_s9, 0  }
  0x26 PF: > { %213 = sbr.rel (%p785_p10) target bundleno = 340 (0x154), region = 32  ;;  %s215_s12 = sand.u32 (!%p785_p10), 1, %s677_s13  }
  0x27   : > { %s463_s20 = sshll.u32 (!%p785_p10), %s215_s12, 5  ;;  %s216_s27 = scalar_lea.sflag (!%p785_p10), [#allocation4], %s215_s12 }
  0x28   : > { %s219_s30 = scalar_lea.vmem (!%p785_p10), [#allocation3], %s463_s20 }
  0x2b   : > { %660 = dma.done.wait (%p777_p8), %s216_s27, 512  }
  0x2c   : > { %662 = vsyncadd (%p777_p8), %s216_s27, 4294966784 }
  0x2d   : > { %664 = dma.done.wait (%p770_p5), [#allocation7], 1024  }
  0x2e   : > { %666 = vsyncadd (%p770_p5), [#allocation7], 4294966272  ;;  %p465_p0 = scmp.ne.s32.totalorder %s685_s15, 0 }
  0x30   : > { %248 = sbr.rel (%p465_p0) target bundleno = 55 (0x37), region = 44 }
  0x35   : > { %v703_v0 = vmov 0.0  }
  0x36   : > { %249 = vst [vmem:[#allocation2] sm:$0x3] %v703_v0 }
  0x37 PF: > { %v491_v1 = vld [vmem:[%s219_s30 + $0x10] sm:$0xff]   ;;  %vm266_vm0 = vcmask 523264   ;;  %v475_v2 = vld [vmem:[%s219_s30] sm:$0xff]   ;;  %v490_v3 = vld [vmem:[%s219_s30 + $0x8] sm:$0xff]   ;;  %s466_s21 = sshll.u32 %s685_s15, 5  ;;  %v306_v27 = vlaneseq  ;;  %vm311_vm1 = vcmask 130112  }
  0x38   : > { %v484_v4 = vunpack.c.l.bf16 %v491_v1  ;;  %v476_v5 = vunpack.c.l.bf16 %v475_v2  ;;  %v480_v6 = vunpack.c.l.bf16 %v490_v3  ;;  %v492_v10 = vld [vmem:[%s219_s30 + $0x18] sm:$0xff]   ;;  %v485_v11 = vunpack.c.h.bf16 %v491_v1  ;;  %s292_s23 = scalar_lea.vmem [#allocation6], %s466_s21  ;;  %p468_p1 = scmp.ne.s32.totalorder %s685_s15, 1 }
  0x39   : > { %v477_v12 = vunpack.c.h.bf16 %v475_v2  ;;  %v488_v13 = vunpack.c.l.bf16 %v492_v10  ;;  %v489_v17 = vunpack.c.h.bf16 %v492_v10  ;;  %v481_v18 = vunpack.c.h.bf16 %v490_v3  ;;  %v296_v21 = vld [vmem:[%s292_s23 + $0x18] sm:$0xff]  ;;  %v295_v22 = vld [vmem:[%s292_s23 + $0x10] sm:$0xff]  ;;  %v294_v23 = vld [vmem:[%s292_s23 + $0x8] sm:$0xff] }
  0x3a   : > { %v279_v7 = vsel %vm266_vm0, %v484_v4, 0.0  ;;  %v267_v8 = vsel %vm266_vm0, %v476_v5, 0.0  ;;  %v273_v9 = vsel %vm266_vm0, %v480_v6, 0.0  ;;  %v282_v14 = vsel %vm266_vm0, %v485_v11, 0.0  ;;  %345 = vmatpush.msra.mxu0 %v296_v21  ;;  %v293_v24 = vld [vmem:[%s292_s23] sm:$0xff] }
  0x3b   : > { %280 = vadd.xlane.f32.xlu1 %v279_v7  ;;  %268 = vadd.xlane.f32.xlu0 %v267_v8  ;;  %v270_v15 = vsel %vm266_vm0, %v477_v12, 0.0  ;;  %v285_v16 = vsel %vm266_vm0, %v488_v13, 0.0  ;;  %v288_v19 = vsel %vm266_vm0, %v489_v17, 0.0  ;;  %v276_v20 = vsel %vm266_vm0, %v481_v18, 0.0 }
  0x3c   : > { %274 = vadd.xlane.f32.xlu2 %v273_v9  ;;  %346 = vmatpush.msra.mxu0 %v295_v22  ;;  %v307_v29 = vand.u32 127, %v306_v27  ;;  %vm315_vm2 = vcmask 195712   ;;  %vm319_vm3 = vcmask 261312   ;;  %vm328_vm4 = vcmask 1041409  }
  0x3d   : > { %vm330_vm5 = vcmask 261120   ;;  %v297_v53 = vld [vmem:[#allocation2] sm:$0x3] }
  0x3e   : > { %347 = vmatpush.msra.mxu0 %v294_v23  ;;  %v309_v30 = vadd.s32 4294967288, %v307_v29  ;;  %v313_v36 = vadd.s32 4294967280, %v307_v29  ;;  %v317_v39 = vadd.s32 4294967272, %v307_v29 }
  0x40   : > { %348 = vmatpush.msra.mxu0 %v293_v24 }
  0x43   : > { %283 = vadd.xlane.f32.xlu1 %v282_v14  ;;  %271 = vadd.xlane.f32.xlu0 %v270_v15 }
  0x44   : > { %286 = vadd.xlane.f32.xlu2 %v285_v16 }
  0x4b   : > { %289 = vadd.xlane.f32.xlu1 %v288_v19  ;;  %277 = vadd.xlane.f32.xlu0 %v276_v20 }
  0xae   : > { %v281_v25 = vpop.xlane.xlu1 %280  ;;  %v269_v26 = vpop.xlane.xlu0 %268 }
  0xaf   : > { %v275_v28 = vpop.xlane.xlu2 %274  ;;  %v321_v37 = vperm.slane %v281_v25, %v307_v29  ;;  %v308_v38 = vperm.slane %v269_v26, %v307_v29 }
  0xb0   : > { %v314_v43 = vperm.slane %v275_v28, %v313_v36 }
  0xb6   : > { %v284_v31 = vpop.xlane.xlu1 %283  ;;  %v272_v32 = vpop.xlane.xlu0 %271 }
  0xb7   : > { %v322_v33 = vperm.slane %v284_v31, %v309_v30  ;;  %v310_v34 = vperm.slane %v272_v32, %v309_v30  ;;  %v287_v35 = vpop.xlane.xlu2 %286 }
  0xb8   : > { %v324_v40 = vperm.slane %v287_v35, %v313_v36 }
  0xb9   : > { %v323_v41 = vsel %vm311_vm1, %v322_v33, %v321_v37  ;;  %v312_v42 = vsel %vm311_vm1, %v310_v34, %v308_v38 }
  0xba   : > { %v325_v48 = vsel %vm315_vm2, %v324_v40, %v323_v41  ;;  %v316_v49 = vsel %vm315_vm2, %v314_v43, %v312_v42 }
  0xbe   : > { %v290_v44 = vpop.xlane.xlu1 %289  ;;  %v278_v45 = vpop.xlane.xlu0 %277 }
  0xbf   : > { %v326_v46 = vperm.slane %v290_v44, %v317_v39  ;;  %v318_v47 = vperm.slane %v278_v45, %v317_v39 }
  0xc1   : > { %v320_v50 = vsel %vm319_vm3, %v318_v47, %v316_v49  ;;  %v327_v51 = vsel %vm319_vm3, %v326_v46, %v325_v48 }
  0xc2   : > { %v329_v52 = vsel %vm328_vm4, %v327_v51, %v320_v50 }
  0xc3   : > { %467 = vmatmul.msk.f32.vlgmr.msra.gmra.mxu0 %vm330_vm5, %v329_v52 }
 0x13f   : > { %358 = sbr.rel (%p468_p1) target bundleno = 334 (0x14e), region = 48 }
 0x140   : > { %v350_v54 = vpop.f32.mrf.mxu0 }
 0x141   : > { %v353_v55 = vadd.f32 %v350_v54, %v297_v53 }
 0x143   : > { %354 = vst [vmem:[#allocation2] sm:$0x3] %v353_v55 }
 0x144   : > { %v576_v57 = vld [vmem:[%s868_s2] ss:$0 sm:$0xff] }
 0x14a   : > { %v359_v56 = vld [vmem:[#allocation2] sm:$0x3] }
 0x14b   : > { %v364_v58 = vadd.f32 %v576_v57, %v359_v56 }
 0x14d   : > { %365 = vst [vmem:[#allocation8] sm:$0x3] %v364_v58 }
 0x14e PF: > { %p516_p2 = scmp.eq.s32.totalorder %s453_s18, 1  ;;  %s376_s28 = sshll.u32 %s869_s3, 4  ;;  %s377_s28 = int_to_ptr.hbm [resolvable:$true] %s376_s28 }
 0x14f   : > { %s704_s29 = smov [#allocation8]  }
 0x150   : > { %s374_s4 = sshll.u32 %s704_s29, 4  ;;  %s375_s4 = int_to_ptr.vmem [resolvable:$true] %s374_s4 }
 0x151   : > { %507 = dma.vmem_to_hbm [thread:$0]  (%p516_p2), %s375_s4, 32, %s377_s28, [#allocation5]  }
 0x152   : > { %668 = dma.done.wait (%p516_p2), [#allocation5], 32  }
 0x153   : > { %670 = vsyncadd (%p516_p2), [#allocation5], 4294967264 }
 0x154 PF: > { %s18_s17 = sadd.s32 1, %s693_s17   ;;  %s874_s12 = smov %s677_s13 }
 0x155   : > { %p15_p3 = scmp.ge.s32.totalorder %s18_s17, 4   ;;  %s875_s13 = smov %s681_s14 }
 0x156   : > { %s876_s14 = smov %s783_s25  ;;  %s877_s15 = smov %s689_s16 }
 0x157   : > { %s878_s16 = smov %s880_s19  ;;  %17 = sbr.rel (!%p15_p3) target bundleno = 6 (0x6), region = 88 }
 0x15c   :  { %390 = vsyncpa [#allocation4], 1 }
 0x15d   :  { %392 = vsyncpa [#allocation4 + $0x1], 1 }
 0x15e   :  { %393 = vsyncpa [#allocation7], 1 }
 0x15f   :  { %394 = vsyncpa [#allocation5], 1 }
 0x160   :  { %396 = vsyncpa [#allocation5 + $0x1], 1 }

</bundles_post_ra>
